<compile_context>
chip_gen: v6e
topology: v6e:2x2x1
jax: 0.10.0
libtpu: 0.0.40
codegen_flags: <defaults>
</compile_context>

<pallas_src>
import functools
import math

import jax
import jax.numpy as jnp
from jax import lax
from jax.experimental import pallas as pl
from jax.experimental.pallas import tpu as pltpu

MASK_VALUE = -1e30  # large negative finite value (avoids -inf - -inf NaNs)


# ----------------------------------------------------------------------------
# ALiBi slopes (same schedule as the PyTorch AliBiPositionalEncoding)
# ----------------------------------------------------------------------------
def alibi_slopes(num_heads):
    def get_slopes_power_of_2(n):
        start = 2 ** (-2 ** (-(math.log2(n) - 3)))
        ratio = start
        return [start * ratio ** i for i in range(n)]

    if math.log2(num_heads).is_integer():
        slopes = get_slopes_power_of_2(num_heads)
    else:
        closest = 2 ** math.floor(math.log2(num_heads))
        slopes = get_slopes_power_of_2(closest)
        slopes += slopes[-1:] * (num_heads - closest)
    return jnp.asarray(slopes, dtype=jnp.float32).reshape(num_heads, 1)


# ----------------------------------------------------------------------------
# Fused linear kernel: y = x @ W + b   (wide QKV projection, bf16 MXU, f32 acc)
# ----------------------------------------------------------------------------
def _linear_kernel(x_ref, w_ref, b_ref, o_ref):
    acc = jnp.dot(x_ref[...], w_ref[...], preferred_element_type=jnp.float32)
    o_ref[...] = (acc + b_ref[...].astype(jnp.float32)).astype(o_ref.dtype)


def _linear(x2d, w, b, *, block_m=128, out_dtype=None):
    M, K = x2d.shape
    K2, N = w.shape
    assert K == K2
    out_dtype = out_dtype or x2d.dtype
    block_m = min(block_m, M)
    assert M % block_m == 0
    return pl.pallas_call(
        _linear_kernel,
        out_shape=jax.ShapeDtypeStruct((M, N), out_dtype),
        grid_spec=pltpu.PrefetchScalarGridSpec(
            num_scalar_prefetch=0,
            grid=(M // block_m,),
            in_specs=[
                pl.BlockSpec((block_m, K), lambda i: (i, 0)),
                pl.BlockSpec((K, N), lambda i: (0, 0)),
                pl.BlockSpec((1, N), lambda i: (0, 0)),
            ],
            out_specs=pl.BlockSpec((block_m, N), lambda i: (i, 0)),
        ),
        compiler_params=pltpu.CompilerParams(dimension_semantics=("parallel",)),
    )(x2d, w, b.reshape(1, N))


# ----------------------------------------------------------------------------
# Flash attention kernel (online softmax, ALiBi + causal, fused W_o epilogue)
# ----------------------------------------------------------------------------
def _flash_mha_kernel(slopes_ref, q_ref, k_ref, v_ref, wo_ref, bo_ref,
                      o_ref, m_scr, l_scr, acc_scr, *, block_q, block_k):
    qi = pl.program_id(1)
    ki = pl.program_id(2)

    q_last_row = qi * block_q + (block_q - 1)
    diag_k = q_last_row // block_k          # last kv block that contributes

    @pl.when(ki == 0)
    def _init():
        m_scr[...] = jnp.full_like(m_scr, MASK_VALUE)
        l_scr[...] = jnp.zeros_like(l_scr)
        acc_scr[...] = jnp.zeros_like(acc_scr)

    def _accumulate(apply_mask):
        q = q_ref[0]  # (H, bq, D) bf16, pre-scaled by 1/sqrt(D)
        k = k_ref[0]  # (H, bk, D)
        v = v_ref[0]  # (H, bk, D)

        # Scores on the MXU (bf16 in, f32 accumulate).
        s = jnp.einsum('hqd,hkd->hqk', q, k,
                       preferred_element_type=jnp.float32)

        # ALiBi bias (shift-invariant form: only the +slope*col term).
        col = ki * block_k + lax.broadcasted_iota(jnp.int32, (1, block_k), 1)
        bias = slopes_ref[...] * col.astype(jnp.float32)     # (H, bk)
        s = s + bias[:, None, :]

        if apply_mask:  # only diagonal-straddling blocks pay for the mask
            row = qi * block_q + lax.broadcasted_iota(
                jnp.int32, (block_q, block_k), 0)
            col2 = ki * block_k + lax.broadcasted_iota(
                jnp.int32, (block_q, block_k), 1)
            s = jnp.where((col2 > row)[None], MASK_VALUE, s)

        # Online softmax update (all f32).
        m_prev = m_scr[...]                                   # (H, bq)
        m_new = jnp.maximum(m_prev, jnp.max(s, axis=-1))
        alpha = jnp.exp(m_prev - m_new)
        p = jnp.exp(s - m_new[:, :, None])                    # (H, bq, bk)
        l_scr[...] = alpha * l_scr[...] + jnp.sum(p, axis=-1)
        acc_scr[...] = alpha[:, :, None] * acc_scr[...] + jnp.einsum(
            'hqk,hkd->hqd', p.astype(v.dtype), v,
            preferred_element_type=jnp.float32)
        m_scr[...] = m_new

    # Fully visible (below diagonal) -> no mask needed.
    fully_visible = (ki + 1) * block_k - 1 <= qi * block_q
    # Straddling the diagonal -> mask needed.
    straddling = jnp.logical_and(ki <= diag_k, jnp.logical_not(fully_visible))

    @pl.when(fully_visible)
    def _fast():
        _accumulate(False)

    @pl.when(straddling)
    def _masked():
        _accumulate(True)

    # Finalize at the diagonal block; all later kv steps are pure no-ops
    # (their K/V DMA is also skipped via the clamped index_map).
    @pl.when(ki == diag_k)
    def _finalize():
        inv_l = pl.reciprocal(l_scr[...], approx=True)        # EUP slot
        ctx = (acc_scr[...] * inv_l[:, :, None]).astype(wo_ref.dtype)  # (H,bq,D)
        # Fused output projection: out = sum_h ctx_h @ W_o[h]  (W_o as (H,D,E)).
        partial = lax.dot_general(
            ctx, wo_ref[...],
            dimension_numbers=(((2,), (1,)), ((0,), (0,))),
            preferred_element_type=jnp.float32)                # (H, bq, E)
        res = jnp.sum(partial, axis=0) + bo_ref[...].astype(jnp.float32)
        o_ref[0] = res.astype(o_ref.dtype)                     # lane-dense (bq,E)


# ----------------------------------------------------------------------------
# Optional attention-weights kernel (only when the caller needs (B,H,S,S))
# ----------------------------------------------------------------------------
def _attn_weights_kernel(slopes_ref, q_ref, k_ref, w_ref, *, block_q):
    qi = pl.program_id(1)
    q = q_ref[0]                 # (H, bq, D) bf16 pre-scaled
    k = k_ref[0]                 # (H, S, D)  bf16
    seq_len = k.shape[1]
    s = jnp.einsum('hqd,hkd->hqk', q, k, preferred_element_type=jnp.float32)
    col = lax.broadcasted_iota(jnp.int32, (1, seq_len), 1)
    s = s + (slopes_ref[...] * col.astype(jnp.float32))[:, None, :]
    row = qi * block_q + lax.broadcasted_iota(jnp.int32, (block_q, seq_len), 0)
    col2 = lax.broadcasted_iota(jnp.int32, (block_q, seq_len), 1)
    s = jnp.where((col2 > row)[None], MASK_VALUE, s)
    m = jnp.max(s, axis=-1, keepdims=True)
    p = jnp.exp(s - m)
    w_ref[0] = (p / jnp.sum(p, axis=-1, keepdims=True)).astype(w_ref.dtype)


# ----------------------------------------------------------------------------
# Wrapper: full MaskedMultiHeadSelfAttention forward
# ----------------------------------------------------------------------------
def masked_mha(x, w_qkv, b_qkv, w_out, b_out, num_heads, *, position=True,
               block_q=128, block_k=128, block_m=128,
               return_attention_weights=False):
    # block_q/block_k default 128 (v5e MXU / test shapes); pass 256 on v6e/v7x
    # (and set vmem_limit_bytes) to feed the 2x256^2 MXU.
    B, S, E = x.shape
    H = num_heads
    assert E % H == 0, "embed_dim must be divisible by num_heads"
    D = E // H
    block_q = min(block_q, S)
    block_k = min(block_k, S)
    assert S % block_q == 0 and S % block_k == 0
    out_dtype = x.dtype

    # ---- 0) fold softmax scale into the q-columns of the QKV projection ----
    sm_scale = 1.0 / math.sqrt(D)
    col_ids = jnp.arange(3 * E)
    scale_vec = jnp.where((col_ids % (3 * D)) < D, sm_scale, 1.0)
    w_qkv_s = (w_qkv * scale_vec[None, :].astype(w_qkv.dtype)).astype(jnp.bfloat16)
    b_qkv_s = (b_qkv * scale_vec.astype(b_qkv.dtype)).astype(jnp.float32)

    # ---- 1) fused QKV projection: one wide (E, 3E) bf16 matmul -------------
    x_bf = x.astype(jnp.bfloat16)
    qkv = _linear(x_bf.reshape(B * S, E), w_qkv_s, b_qkv_s,
                  block_m=block_m, out_dtype=jnp.bfloat16)
    qkv = qkv.reshape(B, S, H, 3 * D)
    q = jnp.transpose(qkv[..., :D], (0, 2, 1, 3))          # (B, H, S, D) bf16
    k = jnp.transpose(qkv[..., D:2 * D], (0, 2, 1, 3))
    v = jnp.transpose(qkv[..., 2 * D:], (0, 2, 1, 3))

    slopes = alibi_slopes(H) if position else jnp.zeros((H, 1), jnp.float32)
    wo3 = w_out.astype(jnp.bfloat16).reshape(H, D, E)       # (H, D, E)
    bo = b_out.astype(jnp.float32).reshape(1, E)

    nq = S // block_q
    nk = S // block_k

    # Clamp the kv block index to the diagonal block: post-diagonal grid steps
    # reuse the same block index, so Pallas issues NO K/V DMA for them.
    def kv_index_map(b, i, j):
        last = (i * block_q + (block_q - 1)) // block_k
        return (b, 0, jnp.minimum(j, last), 0)

    # ---- 2) flash attention + fused output projection ----------------------
    kernel = functools.partial(_flash_mha_kernel,
                               block_q=block_q, block_k=block_k)
    out = pl.pallas_call(
        kernel,
        out_shape=jax.ShapeDtypeStruct((B, S, E), out_dtype),
        grid_spec=pltpu.PrefetchScalarGridSpec(
            num_scalar_prefetch=0,
            grid=(B, nq, nk),
            in_specs=[
                pl.BlockSpec((H, 1), lambda b, i, j: (0, 0)),                    # slopes
                pl.BlockSpec((1, H, block_q, D), lambda b, i, j: (b, 0, i, 0)),  # q
                pl.BlockSpec((1, H, block_k, D), kv_index_map),                  # k
                pl.BlockSpec((1, H, block_k, D), kv_index_map),                  # v
                pl.BlockSpec((H, D, E), lambda b, i, j: (0, 0, 0)),              # W_o
                pl.BlockSpec((1, E), lambda b, i, j: (0, 0)),                    # b_o
            ],
            out_specs=pl.BlockSpec((1, block_q, E), lambda b, i, j: (b, i, 0)),
            scratch_shapes=[
                pltpu.VMEM((H, block_q), jnp.float32),      # running max m
                pltpu.VMEM((H, block_q), jnp.float32),      # running denom l
                pltpu.VMEM((H, block_q, D), jnp.float32),   # f32 accumulator
            ],
        ),
        compiler_params=pltpu.CompilerParams(
            dimension_semantics=("parallel", "parallel", "arbitrary")),
    )(slopes, q, k, v, wo3, bo)

    if not return_attention_weights:
        return out

    # ---- 3) optional attention-weights path (parity with PyTorch return) ---
    wkernel = functools.partial(_attn_weights_kernel, block_q=block_q)
    attn = pl.pallas_call(
        wkernel,
        out_shape=jax.ShapeDtypeStruct((B, H, S, S), jnp.float32),
        grid_spec=pltpu.PrefetchScalarGridSpec(
            num_scalar_prefetch=0,
            grid=(B, nq),
            in_specs=[
                pl.BlockSpec((H, 1), lambda b, i: (0, 0)),
                pl.BlockSpec((1, H, block_q, D), lambda b, i: (b, 0, i, 0)),
                pl.BlockSpec((1, H, S, D), lambda b, i: (b, 0, 0, 0)),
            ],
            out_specs=pl.BlockSpec((1, H, block_q, S), lambda b, i: (b, 0, i, 0)),
        ),
        compiler_params=pltpu.CompilerParams(
            dimension_semantics=("parallel", "parallel")),
    )(slopes, q, k)
    return out, attn


# ----------------------------------------------------------------------------
# Pure-JAX reference (mirrors the PyTorch forward) for correctness checking
# ----------------------------------------------------------------------------
def _reference_mha(x, w_qkv, b_qkv, w_out, b_out, num_heads, position=True):
    B, S, E = x.shape
    H = num_heads
    D = E // H
    qkv = x @ w_qkv + b_qkv
    qkv = qkv.reshape(B, S, H, 3 * D)
    q, k, v = qkv[..., :D], qkv[..., D:2 * D], qkv[..., 2 * D:]
    scores = jnp.einsum('bqhd,bkhd->bhqk', q, k) / math.sqrt(D)
    if position:
        slopes = alibi_slopes(H).reshape(1, H, 1, 1)
        pos = jnp.arange(S)
        dist = (pos[None, :] - pos[:, None]).astype(scores.dtype)
        scores = scores + slopes * dist[None, None]
    mask = jnp.tril(jnp.ones((S, S), dtype=bool))
    scores = jnp.where(mask[None, None], scores, -jnp.inf)
    attn = jax.nn.softmax(scores, axis=-1)
    ctx = jnp.einsum('bhqk,bkhd->bqhd', attn, v).reshape(B, S, E)
    return ctx @ w_out + b_out, attn


if __name__ == "__main__":
    B, S, E, H = 2, 256, 128, 4   # small shapes; exercises multi-block tiling

    key = jax.random.PRNGKey(0)
    kx, k1, k2, k3, k4 = jax.random.split(key, 5)
    x = jax.random.normal(kx, (B, S, E), dtype=jnp.float32)
    # Pre-transposed weights: (in_features, out_features)
    w_qkv = 0.02 * jax.random.normal(k1, (E, 3 * E), dtype=jnp.float32)
    b_qkv = 0.02 * jax.random.normal(k2, (3 * E,), dtype=jnp.float32)
    w_out = 0.02 * jax.random.normal(k3, (E, E), dtype=jnp.float32)
    b_out = 0.02 * jax.random.normal(k4, (E,), dtype=jnp.float32)

    out, attn = masked_mha(x, w_qkv, b_qkv, w_out, b_out, num_heads=H,
                           position=True, block_q=128, block_k=128,
                           return_attention_weights=True)
    out, attn = jax.block_until_ready((out, attn))

    ref_out, ref_attn = _reference_mha(x, w_qkv, b_qkv, w_out, b_out, H,
                                       position=True)
    err_out = float(jnp.max(jnp.abs(out - ref_out)))
    err_attn = float(jnp.max(jnp.abs(attn - ref_attn)))

    assert out.shape == (B, S, E)
    assert attn.shape == (B, H, S, S)
    assert err_out < 2e-2 and err_attn < 2e-2, (err_out, err_attn)
    print("KERNEL_OK")
</pallas_src>

<mosaic_0001>
module attributes {stable_mosaic.version = 11 : i64} {
  func.func @_linear_kernel(%arg0: i32, %arg1: memref<128x128xbf16, #tpu.memory_space<vmem>>, %arg2: memref<128x384xbf16, #tpu.memory_space<vmem>>, %arg3: memref<1x384xf32, #tpu.memory_space<vmem>>, %arg4: memref<128x384xbf16, #tpu.memory_space<vmem>>) attributes {dimension_semantics = [#tpu.dimension_semantics<parallel>], iteration_bounds = array<i64: 4>, scalar_prefetch = 0 : i64, scratch_operands = 0 : i64, tpu.core_type = #tpu.core_type<tc>, window_params = [{transform_indices = @transform_0, window_bounds = array<i64: 128, 128>}, {pipeline_mode = #tpu.pipeline_mode<synchronous>, transform_indices = @transform_1, window_bounds = array<i64: 128, 384>}, {pipeline_mode = #tpu.pipeline_mode<synchronous>, transform_indices = @transform_2, window_bounds = array<i64: 1, 384>}, {transform_indices = @transform_3, window_bounds = array<i64: 128, 384>}]} {
    %c0 = arith.constant 0 : index
    %c0_0 = arith.constant 0 : index
    %0 = vector.load %arg1[%c0, %c0_0] : memref<128x128xbf16, #tpu.memory_space<vmem>>, vector<128x128xbf16>
    %c0_1 = arith.constant 0 : index
    %c0_2 = arith.constant 0 : index
    %1 = vector.load %arg2[%c0_1, %c0_2] : memref<128x384xbf16, #tpu.memory_space<vmem>>, vector<128x384xbf16>
    %cst = arith.constant dense<0.000000e+00> : vector<128x384xf32>
    %2 = tpu.matmul %0, %1, %cst {dimension_numbers = #tpu.dot_dimension_numbers<[1], [0], [0], [1], [0, 0, 1, 1], [], []>} : vector<128x128xbf16>, vector<128x384xbf16>, vector<128x384xf32> -> vector<128x384xf32>
    %c0_3 = arith.constant 0 : index
    %c0_4 = arith.constant 0 : index
    %3 = vector.load %arg3[%c0_3, %c0_4] : memref<1x384xf32, #tpu.memory_space<vmem>>, vector<1x384xf32>
    %4 = vector.broadcast %3 : vector<1x384xf32> to vector<128x384xf32>
    %5 = arith.addf %2, %4 : vector<128x384xf32>
    %6 = arith.truncf %5 : vector<128x384xf32> to vector<128x384xbf16>
    %c0_5 = arith.constant 0 : index
    %c0_6 = arith.constant 0 : index
    %7 = vector.load %arg4[%c0_5, %c0_6] : memref<128x384xbf16, #tpu.memory_space<vmem>>, vector<128x384xbf16>
    tpu.vector_store %arg4[%c0_5, %c0_6], %6 {strides = array<i32>} : memref<128x384xbf16, #tpu.memory_space<vmem>>, vector<128x384xbf16>,
    return
  }
  func.func @transform_0(%arg0: i32) -> (i32, i32) {
    %c0_i32 = arith.constant 0 : i32
    %c0_i32_0 = arith.constant 0 : i32
    return %arg0, %c0_i32 : i32, i32
  }
  func.func @transform_1(%arg0: i32) -> (i32, i32) {
    %c0_i32 = arith.constant 0 : i32
    %c0_i32_0 = arith.constant 0 : i32
    %c0_i32_1 = arith.constant 0 : i32
    return %c0_i32, %c0_i32_0 : i32, i32
  }
  func.func @transform_2(%arg0: i32) -> (i32, i32) {
    %c0_i32 = arith.constant 0 : i32
    %c0_i32_0 = arith.constant 0 : i32
    %c0_i32_1 = arith.constant 0 : i32
    return %c0_i32, %c0_i32_0 : i32, i32
  }
  func.func @transform_3(%arg0: i32) -> (i32, i32) {
    %c0_i32 = arith.constant 0 : i32
    %c0_i32_0 = arith.constant 0 : i32
    return %arg0, %c0_i32 : i32, i32
  }
}

</mosaic_0001>

<bundles_post_ra>
// kernel: tpu_custom_call.1
= control target key start
LH: loop header
LB: loop body
LE: loop exit
PB: predicated region body
PF: predicated region fallthrough
CT: control target
= control target key end

     0   :  { %8 = vsyncpa [#allocation3], 0  ;;  %s1654_s0 = inlined_call_operand.hbm [shape: bf16[512,128], index: 0, kind: input, shape index: {}]   ;;  %s1655_s1 = inlined_call_operand.hbm [shape: bf16[128,384], index: 1, kind: input, shape index: {}]   ;;  %s1656_s2 = inlined_call_operand.vmem [shape: f32[1,384], index: 2, kind: input, shape index: {}]   ;;  %s1657_s3 = inlined_call_operand.hbm [shape: bf16[512,384], index: 3, kind: output, shape index: {}]  }
   0x1   :  { %10 = vsyncpa [#allocation3 + $0x1], 0 }
   0x2   :  { %11 = vsyncpa [#allocation6], 0 }
   0x3   :  { %12 = vsyncpa [#allocation4], 0 }
   0x4   :  { %14 = vsyncpa [#allocation4 + $0x1], 0  ;;  %s1368_s12 = smov 0   ;;  %s1370_s13 = smov 0  }
   0x5   :  { %s1372_s14 = smov 0   ;;  %s1374_s15 = smov 0  }
   0x6 LB: > { %s1389_s16 = sadd.s32 4294967295, %s1336_s15   ;;  %s948_s17 = sadd.s32 4294967294, %s1336_s15   ;;  %s1336_s15 = sphi %s1374_s15, %s1678_s15   ;;  %s1332_s14 = sphi %s1372_s14, %s1677_s14   ;;  %s1328_s13 = sphi %s1370_s13, %s1676_s13   ;;  %s1324_s12 = sphi %s1368_s12, %s1675_s12  }
   0x7   : > { %p40_p0 = scmp.ne.s32.totalorder %s1328_s13, %s1324_s12  ;;  %p1658_p1 = scmp.eq.s32.totalorder %s1389_s16, 0 }
   0x8   : > { %p112_p3 = scmp.eq.s32.totalorder %s948_s17, 3  ;;  %p949_p5 = scmp.ge.s32.totalorder %s1336_s15, 1 }
   0x9   : > { %p1398_p4 = por %p1658_p1, %p40_p0  ;;  %p119_p7 = scmp.lt.s32.totalorder %s1336_s15, 5 }
   0xa   : > { %p1403_p6 = por %p112_p3, %p40_p0  ;;  %s1338_s21 = smov [#allocation5]  }
   0xb   : > { %s1662_s18 = scalar_select %p1398_p4, 1, 0 }
   0xc   : > { %s1663_s19 = scalar_select %p1403_p6, 1, 0 }
   0xd   : > { %p1408_p8 = pnand %p949_p5, %p119_p7  ;;  %s131_s22 = sshll.u32 %s1338_s21, 4  ;;  %s132_s22 = int_to_ptr.vmem [resolvable:$true] %s131_s22 }
   0xe   : > { %s1421_s24 = sadd.s32 1, %s1336_s15   ;;  %s27_s25 = sadd.s32 1, %s1332_s14 }
   0xf   : > { %s1664_s20 = scalar_select %p1408_p8, 1, 0 }
  0x10   : > { %p1118_p9 = pneg %p1408_p8  ;;  %s24_s26 = ssub.s32 %s1336_s15, %s1421_s24 }
  0x11   : > { %s1225_s27 = scalar_lea.vmem %s132_s22, 3072  ;;  %p1233_p3 = scmp.lt.s32.totalorder %s132_s22, %s132_s22 }
  0x12   : > { %p1416_p10 = pnand %p1118_p9, %p1658_p1  ;;  %p1226_p12 = scmp.ne.s32.totalorder %s132_s22, %s1225_s27 }
  0x13   : > { %p1234_p5 = scmp.lt.s32.totalorder %s1225_s27, %s1225_s27 }
  0x14   : > { %p1216_p11 = pneg %p1416_p10 }
  0x15   : > { %p1235_p7 = por %p1234_p5, %p1233_p3 }
  0x16   : > { %p1228_p13 = pnand %p1226_p12, %p1216_p11 }
  0x18   : > { %p1229_p0 = pneg %p1228_p13 }
  0x1a   : > { %p1236_p2 = pnand %p1235_p7, %p1229_p0 }
  0x1c   : > { %1239 = shalt.err (!%p1236_p2)
}
  0x1d   : > { %s1339_s28 = smov 192   ;;  %s1340_s29 = smov 12  }
  0x1e   : > { %1121 = dma.hbm_to_vmem [thread:$0]  (!%p1416_p10), %s1655_s1, 3072, %s132_s22, [#allocation6], %s1339_s28, %s1339_s28, %s1340_s29  }
  0x1f   : > { %p25_p9 = scmp.eq.s32.totalorder %s24_s26, 0  ;;  %p34_p11 = scmp.ne.s32.totalorder %s1332_s14, %s1328_s13 }
  0x20   : > { %p35_p12 = scmp.eq.s32.totalorder %s1336_s15, 0  ;;  %p1131_p2 = scmp.lt.s32.totalorder %s1336_s15, 4 }
  0x21   : > { %s1438_s5 = scalar_select %p25_p9, %s1332_s14, %s27_s25  }
  0x22   : > { %p36_p13 = por %p35_p12, %p34_p11  ;;  %p1666_p0 = scmp.eq.s32.totalorder %s1389_s16, 3 }
  0x23   : > { %s148_s7 = sand.u32 1, %s1332_s14   ;;  %s1027_s8 = sshll.u32 %s1336_s15, 10 }
  0x24   : > { %p1442_p3 = por %p1666_p0, %p34_p11  ;;  %s952_s9 = sshll.u32 %s148_s7, 6 }
  0x25   : > { %s1451_s17 = scalar_lea.hbm %s1654_s0, %s1027_s8  ;;  %s152_s21 = scalar_lea.vmem [#allocation2], %s952_s9 }
  0x26   : > { %s1667_s6 = scalar_select %p1442_p3, 1, 0 }
  0x27   : > { %s159_s22 = sshll.u32 %s152_s21, 4  ;;  %p1453_p10 = pnand %p1131_p2, %p36_p13  ;;  %s1457_s22 = int_to_ptr.vmem [resolvable:$true] %s159_s22 }
  0x28   : > { %s1459_s25 = scalar_lea.sflag [#allocation3], %s148_s7  ;;  %s1240_s26 = scalar_lea.hbm %s1451_s17, 1024 }
  0x29   : > { %p1241_p5 = scmp.ne.s32.totalorder %s1451_s17, %s1240_s26  ;;  %p1242_p7 = pneg %p1453_p10 }
  0x2a   : > { %s1245_s29 = scalar_lea.hbm %s1654_s0, 4096  ;;  %p1246_p12 = scmp.lt.s32.totalorder %s1451_s17, %s1654_s0 }
  0x2b   : > { %p1243_p9 = pnand %p1242_p7, %p1241_p5  ;;  %p1247_p2 = scmp.lt.s32.totalorder %s1245_s29, %s1240_s26 }
  0x2d   : > { %p1244_p11 = pneg %p1243_p9  ;;  %p1248_p13 = por %p1247_p2, %p1246_p12 }
  0x2f   : > { %p1249_p0 = pnand %p1248_p13, %p1244_p11 }
  0x31   : > { %1252 = shalt.err (!%p1249_p0)
}
  0x32   : > { %s1253_s7 = scalar_lea.vmem %s1457_s22, 1024  ;;  %s1341_s8 = smov [#allocation2]  }
  0x33   : > { %p1254_p1 = scmp.ne.s32.totalorder %s1457_s22, %s1253_s7  ;;  %s1258_s9 = sshll.u32 %s1341_s8, 4  ;;  %s1259_s9 = int_to_ptr.vmem [resolvable:$false] %s1258_s9 }
  0x34   : > { %s1260_s10 = scalar_lea.vmem %s1259_s9, 2048  ;;  %p1261_p9 = scmp.lt.s32.totalorder %s1457_s22, %s1259_s9 }
  0x35   : > { %p1256_p6 = pnand %p1254_p1, %p1242_p7  ;;  %p1262_p3 = scmp.lt.s32.totalorder %s1260_s10, %s1253_s7 }
  0x37   : > { %p1257_p5 = pneg %p1256_p6  ;;  %p1263_p4 = por %p1262_p3, %p1261_p9 }
  0x39   : > { %p1264_p8 = pnand %p1263_p4, %p1257_p5 }
  0x3b   : > { %1267 = shalt.err (!%p1264_p8)
}
  0x3c   : > { %s1342_s11 = smov 64   ;;  %s1343_s21 = smov 4  }
  0x3d   : > { %1125 = dma.hbm_to_vmem [thread:$0]  (!%p1453_p10), %s1451_s17, 1024, %s1457_s22, %s1459_s25, %s1342_s11, %s1342_s11, %s1343_s21  }
  0x3e   : > { %p1669_p1 = scmp.ne.s32.totalorder %s1664_s20, 0 }
  0x3f   : > { %s1483_s26 = sand.u32 (!%p1669_p1), 1, %s1328_s13   ;;  %p1670_p4 = scmp.ne.s32.totalorder (!%p1669_p1), %s1662_s18, 0 }
  0x40   : > { %171 = sbr.rel (%p1669_p1) target bundleno = 379 (0x17b), region = 32  ;;  %s956_s27 = sshll.u32 (!%p1669_p1), %s1483_s26, 6 }
  0x41   : > { %s174_s28 = scalar_lea.sflag (!%p1669_p1), [#allocation3], %s1483_s26  ;;  %s1487_s29 = scalar_lea.vmem (!%p1669_p1), [#allocation2], %s956_s27 }
  0x45   : > { %1311 = dma.done.wait (%p1670_p4), %s174_s28, 1024  }
  0x46   : > { %1313 = vsyncadd (%p1670_p4), %s174_s28, 4294966272  ;;  %p1671_p6 = scmp.eq.s32.totalorder %s1389_s16, 0 }
  0x48   : > { %1315 = dma.done.wait (%p1671_p6), [#allocation6], 3072   ;;  %p1672_p8 = pmov %p1671_p6 }
  0x49   : > { %v1344_v0 = vmov 0   ;;  %v1174_v1 = vld [vmem:[#allocation5 + $0xac] ss:$12 sps:$4 sm:$0xff]   ;;  %v1176_v2 = vld [vmem:[#allocation5 + $0xa8] ss:$12 sps:$4 sm:$0xff]   ;;  %v1200_v12 = vld [vmem:[%s1487_s29] sm:$0xff]   ;;  %v257_v33 = vlaneseq }
  0x4a   : > { %1317 = vsyncadd (%p1672_p8), [#allocation6], 4294964224  ;;  %480 = vmatprep.mubr.bf16.mxu0 %v1344_v0  ;;  %448 = vmatprep.subr.bf16.mxu0 %v1174_v1  ;;  %v1177_v3 = vld [vmem:[#allocation5 + $0x94] ss:$12 sps:$4 sm:$0xff]   ;;  %v1179_v4 = vld [vmem:[#allocation5 + $0x90] ss:$12 sps:$4 sm:$0xff]  }
  0x4b   : > { %449 = vmatpush1.bf16.msra.mxu0 %v1176_v2  ;;  %v1180_v5 = vld [vmem:[#allocation5 + $0x7c] ss:$12 sps:$4 sm:$0xff]   ;;  %v1182_v6 = vld [vmem:[#allocation5 + $0x78] ss:$12 sps:$4 sm:$0xff]   ;;  %v1185_v9 = vld [vmem:[#allocation5 + $0x60] ss:$12 sps:$4 sm:$0xff]   ;;  %1092 = vmatprep.mubr.bf16.mxu1 %v1200_v12 }
  0x4c   : > { %450 = vmatprep.subr.bf16.mxu0 %v1177_v3  ;;  %v1183_v7 = vld [vmem:[#allocation5 + $0x64] ss:$12 sps:$4 sm:$0xff]   ;;  %v1186_v10 = vld [vmem:[#allocation5 + $0x4c] ss:$12 sps:$4 sm:$0xff]   ;;  %v1188_v14 = vld [vmem:[#allocation5 + $0x48] ss:$12 sps:$4 sm:$0xff]  }
  0x4d   : > { %v1195_v8 = vld [vmem:[#allocation5 + $0xb0] ss:$12 sps:$4 sm:$0xff]   ;;  %v1199_v11 = vld [vmem:[#allocation5 + $0x98] ss:$12 sps:$4 sm:$0xff]   ;;  %v1201_v13 = vld [vmem:[#allocation5 + $0x80] ss:$12 sps:$4 sm:$0xff]  }
  0x4e   : > { %1076 = vmatprep.subr.bf16.mxu1 %v1195_v8  ;;  %v1189_v15 = vld [vmem:[#allocation5 + $0x34] ss:$12 sps:$4 sm:$0xff]   ;;  %v1191_v17 = vld [vmem:[#allocation5 + $0x30] ss:$12 sps:$4 sm:$0xff]   ;;  %v1194_v20 = vld [vmem:[#allocation5 + $0x18] ss:$12 sps:$4 sm:$0xff]  }
  0x4f   : > { %451 = vmatpush1.bf16.msra.mxu0 %v1179_v4  ;;  %1077 = vmatpush3.bf16.msra.mxu1 %v1195_v8  ;;  %v1202_v16 = vld [vmem:[#allocation5 + $0x68] ss:$12 sps:$4 sm:$0xff]   ;;  %v1204_v19 = vld [vmem:[#allocation5 + $0x50] ss:$12 sps:$4 sm:$0xff]   ;;  %v1205_v22 = vld [vmem:[#allocation5 + $0x38] ss:$12 sps:$4 sm:$0xff]  }
  0x50   : > { %452 = vmatprep.subr.bf16.mxu0 %v1180_v5  ;;  %1078 = vmatprep.subr.bf16.mxu1 %v1199_v11  ;;  %v1192_v18 = vld [vmem:[#allocation5 + $0x1c] ss:$12 sps:$4 sm:$0xff]   ;;  %v1196_v21 = vld [vmem:[#allocation5 + $0x4] ss:$12 sps:$4 sm:$0xff]   ;;  %v1198_v23 = vld [vmem:[#allocation5] ss:$12 sps:$4 sm:$0xff]  }
  0x51   : > { %v1207_v24 = vld [vmem:[#allocation5 + $0x20] ss:$12 sps:$4 sm:$0xff]   ;;  %v1208_v25 = vld [vmem:[#allocation5 + $0x8] ss:$12 sps:$4 sm:$0xff]   ;;  %v1209_v28 = vld [vmem:[%s1487_s29 + $0x18] sm:$0xff]   ;;  %v258_v34 = vshrl.u32 %v257_v33, 7 }
  0x52   : > { %v1203_v26 = vld [vmem:[%s1487_s29 + $0x8] sm:$0xff]   ;;  %v1206_v27 = vld [vmem:[%s1487_s29 + $0x10] sm:$0xff]   ;;  %v1210_v29 = vld [vmem:[%s1487_s29 + $0x20] sm:$0xff]   ;;  %s1108_s17 = smul.u32 192, %s1483_s26  ;;  %p1673_p10 = scmp.ne.s32.totalorder %s1667_s6, 0 }
  0x53   : > { %453 = vmatpush1.bf16.msra.mxu0 %v1182_v6  ;;  %1079 = vmatpush3.bf16.msra.mxu1 %v1199_v11  ;;  %v1212_v30 = vld [vmem:[%s1487_s29 + $0x30] sm:$0xff]   ;;  %v1211_v31 = vld [vmem:[%s1487_s29 + $0x28] sm:$0xff]   ;;  %v1213_v32 = vld [vmem:[%s1487_s29 + $0x38] sm:$0xff]   ;;  %v259_v35 = vsub.s32 0, %v258_v34  ;;  %v263_v36 = vsub.s32 1, %v258_v34  ;;  %v267_v44 = vsub.s32 2, %v258_v34 }
  0x54   : > { %454 = vmatprep.subr.bf16.mxu0 %v1183_v7  ;;  %1080 = vmatprep.subr.bf16.mxu1 %v1201_v13  ;;  %v255_v37 = vld [vmem:[%s1656_s2] sm:$0x7]  ;;  %s1523_s22 = scalar_lea.vmem [#allocation7], %s1108_s17  ;;  %s1109_s23 = smul.u32 3072, %s1389_s16 }
  0x55   : > { %v1516_v38 = vrot.slane %v255_v37, %v259_v35  ;;  %v1518_v39 = vrot.slane %v255_v37, %v263_v36  ;;  %v1528_v50 = vrot.slane %v255_v37, %v267_v44  ;;  %s865_s25 = sshll.u32 %s1523_s22, 4  ;;  %s851_s16 = scalar_lea.sflag [#allocation4], %s1483_s26  ;;  %s1611_s25 = int_to_ptr.vmem [resolvable:$true] %s865_s25 }
  0x56   : > { %s1609_s7 = scalar_lea.hbm %s1657_s3, %s1109_s23  ;;  %s1268_s8 = scalar_lea.vmem %s1611_s25, 3072 }
  0x57   : > { %455 = vmatpush1.bf16.msra.mxu0 %v1185_v9  ;;  %1081 = vmatpush3.bf16.msra.mxu1 %v1201_v13  ;;  %p1269_p3 = scmp.ne.s32.totalorder %s1611_s25, %s1268_s8  ;;  %s1345_s9 = smov [#allocation7]  }
  0x58   : > { %456 = vmatprep.subr.bf16.mxu0 %v1186_v10  ;;  %1082 = vmatprep.subr.bf16.mxu1 %v1202_v16  ;;  %s1272_s10 = sshll.u32 %s1345_s9, 4  ;;  %s1273_s10 = int_to_ptr.vmem [resolvable:$false] %s1272_s10 }
  0x59   : > { %p1270_p7 = pnand %p1269_p3, %p1673_p10  ;;  %s1274_s11 = scalar_lea.vmem %s1273_s10, 6144 }
  0x5a   : > { %p1275_p12 = scmp.lt.s32.totalorder %s1611_s25, %s1273_s10  ;;  %p1276_p2 = scmp.lt.s32.totalorder %s1274_s11, %s1268_s8 }
  0x5b   : > { %457 = vmatpush1.bf16.msra.mxu0 %v1188_v14  ;;  %1083 = vmatpush3.bf16.msra.mxu1 %v1202_v16  ;;  %p1271_p11 = pneg %p1270_p7 }
  0x5c   : > { %458 = vmatprep.subr.bf16.mxu0 %v1189_v15  ;;  %1084 = vmatprep.subr.bf16.mxu1 %v1204_v19  ;;  %p1277_p13 = por %p1276_p2, %p1275_p12 }
  0x5e   : > { %p1278_p0 = pnand %p1277_p13, %p1271_p11 }
  0x5f   : > { %459 = vmatpush1.bf16.msra.mxu0 %v1191_v17  ;;  %1085 = vmatpush3.bf16.msra.mxu1 %v1204_v19 }
  0x60   : > { %460 = vmatprep.subr.bf16.mxu0 %v1192_v18  ;;  %1086 = vmatprep.subr.bf16.mxu1 %v1205_v22 }
  0x63   : > { %461 = vmatpush1.bf16.msra.mxu0 %v1194_v20  ;;  %1087 = vmatpush3.bf16.msra.mxu1 %v1205_v22 }
  0x64   : > { %462 = vmatprep.subr.bf16.mxu0 %v1196_v21  ;;  %1088 = vmatprep.subr.bf16.mxu1 %v1207_v24 }
  0x67   : > { %463 = vmatpush1.bf16.msra.mxu0 %v1198_v23  ;;  %1089 = vmatpush3.bf16.msra.mxu1 %v1207_v24 }
  0x68   : > { %1090 = vmatprep.subr.bf16.mxu1 %v1208_v25 }
  0x6a   : > { %481 = vmatmul.mubr.bf16.vlgmr.msra.gmra.mxu0 %v1200_v12 }
  0x6b   : > { %490 = vmatprep.mubr.bf16.mxu0 %v1344_v0  ;;  %1091 = vmatpush3.bf16.msra.mxu1 %v1208_v25 }
  0x6e   : > { %1093 = vmatmul.mubr.bf16.vlgmr.msra.gmra.mxu1 %v1203_v26 }
  0x6f   : > { %1096 = vmatprep.mubr.bf16.mxu1 %v1206_v27 }
  0x72   : > { %491 = vmatmul.mubr.bf16.gmra.mxu0 %v1203_v26 }
  0x73   : > { %500 = vmatprep.mubr.bf16.mxu0 %v1344_v0 }
  0x76   : > { %1097 = vmatmul.mubr.bf16.gmra.mxu1 %v1209_v28 }
  0x77   : > { %1100 = vmatprep.mubr.bf16.mxu1 %v1210_v29 }
  0x7a   : > { %501 = vmatmul.mubr.bf16.gmra.mxu0 %v1206_v27 }
  0x7b   : > { %510 = vmatprep.mubr.bf16.mxu0 %v1344_v0 }
  0x7e   : > { %1101 = vmatmul.mubr.bf16.gmra.mxu1 %v1211_v31 }
  0x7f   : > { %1104 = vmatprep.mubr.bf16.mxu1 %v1212_v30 }
  0x82   : > { %511 = vmatmul.mubr.bf16.gmra.mxu0 %v1209_v28 }
  0x83   : > { %520 = vmatprep.mubr.bf16.mxu0 %v1344_v0 }
  0x86   : > { %1105 = vmatmul.mubr.bf16.gmra.mxu1 %v1213_v32 }
  0x8a   : > { %521 = vmatmul.mubr.bf16.gmra.mxu0 %v1210_v29 }
  0x8b   : > { %530 = vmatprep.mubr.bf16.mxu0 %v1344_v0 }
  0x92   : > { %531 = vmatmul.mubr.bf16.gmra.mxu0 %v1211_v31 }
  0x93   : > { %540 = vmatprep.mubr.bf16.mxu0 %v1344_v0 }
  0x9a   : > { %541 = vmatmul.mubr.bf16.gmra.mxu0 %v1212_v30 }
  0x9b   : > { %550 = vmatprep.mubr.bf16.mxu0 %v1344_v0 }
  0xa2   : > { %551 = vmatmul.mubr.bf16.gmra.mxu0 %v1213_v32 }
 0x12a   : > { %v482_v40 = vpop.f32.mrf.mxu0 }
 0x12b   : > { %v483_v42 = vadd.f32 %v482_v40, %v1516_v38 }
 0x12c   : > { %v484_v41 = vpop.f32.mrf.mxu0 }
 0x12d   : > { %v485_v43 = vadd.f32 %v484_v41, %v1518_v39 }
 0x12e   : > { %v486_v45 = vpop.f32.mrf.mxu0  ;;  %v1094_v54 = vpop.f32.mrf.mxu1 }
 0x12f   : > { %v1028_v46 = vpack.c.bf16 %v485_v43, %v483_v42  ;;  %v487_v48 = vadd.f32 %v486_v45, %v1516_v38  ;;  %v604_v57 = vadd.f32 %v1094_v54, %v1528_v50 }
 0x130   : > { %v488_v47 = vpop.f32.mrf.mxu0  ;;  %v595_v59 = vpop.f32.mrf.mxu1 }
 0x131   : > { %818 = vst [vmem:[%s1523_s22] sm:$0xff] %v1028_v46  ;;  %v489_v49 = vadd.f32 %v488_v47, %v1518_v39  ;;  %v1033_v61 = vpack.c.bf16 %v604_v57, %v604_v57  ;;  %v596_v62 = vadd.f32 %v595_v59, %v1528_v50 }
 0x132   : > { %v492_v51 = vpop.f32.mrf.mxu0  ;;  %v1095_v0 = vpop.f32.mrf.mxu1 }
 0x133   : > { %v1030_v52 = vpack.c.bf16 %v489_v49, %v487_v48  ;;  %v493_v55 = vadd.f32 %v492_v51, %v1516_v38  ;;  %823 = vst [vmem:[%s1523_s22 + $0x20] sm:$0xf] %v1033_v61  ;;  %v1029_v3 = vpack.c.bf16 %v596_v62, %v596_v62  ;;  %v607_v4 = vadd.f32 %v1095_v0, %v1528_v50 }
 0x134   : > { %v494_v53 = vpop.f32.mrf.mxu0  ;;  %v598_v6 = vpop.f32.mrf.mxu1 }
 0x135   : > { %820 = vst [vmem:[%s1523_s22 + $0xc] sm:$0xff] %v1030_v52  ;;  %v495_v56 = vadd.f32 %v494_v53, %v1518_v39  ;;  %819 = vst [vmem:[%s1523_s22 + $0x8] sm:$0xf] %v1029_v3  ;;  %v1035_v8 = vpack.c.bf16 %v607_v4, %v607_v4  ;;  %v599_v9 = vadd.f32 %v598_v6, %v1528_v50 }
 0x136   : > { %v496_v58 = vpop.f32.mrf.mxu0  ;;  %v1098_v11 = vpop.f32.mrf.mxu1 }
 0x137   : > { %v1032_v60 = vpack.c.bf16 %v495_v56, %v493_v55  ;;  %v497_v1 = vadd.f32 %v496_v58, %v1516_v38  ;;  %825 = vst [vmem:[%s1523_s22 + $0x2c] sm:$0xf] %v1035_v8  ;;  %v1031_v14 = vpack.c.bf16 %v599_v9, %v599_v9  ;;  %v620_v15 = vadd.f32 %v1098_v11, %v1528_v50 }
 0x138   : > { %v498_v63 = vpop.f32.mrf.mxu0  ;;  %v611_v17 = vpop.f32.mrf.mxu1 }
 0x139   : > { %822 = vst [vmem:[%s1523_s22 + $0x18] sm:$0xff] %v1032_v60  ;;  %v499_v2 = vadd.f32 %v498_v63, %v1518_v39  ;;  %821 = vst [vmem:[%s1523_s22 + $0x14] sm:$0xf] %v1031_v14  ;;  %v1041_v19 = vpack.c.bf16 %v620_v15, %v620_v15  ;;  %v612_v20 = vadd.f32 %v611_v17, %v1528_v50 }
 0x13a   : > { %v502_v5 = vpop.f32.mrf.mxu0  ;;  %v1099_v22 = vpop.f32.mrf.mxu1 }
 0x13b   : > { %v1034_v7 = vpack.c.bf16 %v499_v2, %v497_v1  ;;  %v503_v12 = vadd.f32 %v502_v5, %v1516_v38  ;;  %831 = vst [vmem:[%s1523_s22 + $0x50] sm:$0xf] %v1041_v19  ;;  %v1037_v25 = vpack.c.bf16 %v612_v20, %v612_v20  ;;  %v623_v26 = vadd.f32 %v1099_v22, %v1528_v50 }
 0x13c   : > { %v504_v10 = vpop.f32.mrf.mxu0  ;;  %v614_v28 = vpop.f32.mrf.mxu1 }
 0x13d   : > { %824 = vst [vmem:[%s1523_s22 + $0x24] sm:$0xff] %v1034_v7  ;;  %v505_v13 = vadd.f32 %v504_v10, %v1518_v39  ;;  %827 = vst [vmem:[%s1523_s22 + $0x38] sm:$0xf] %v1037_v25  ;;  %v1043_v30 = vpack.c.bf16 %v623_v26, %v623_v26  ;;  %v615_v31 = vadd.f32 %v614_v28, %v1528_v50 }
 0x13e   : > { %v506_v16 = vpop.f32.mrf.mxu0  ;;  %v1102_v33 = vpop.f32.mrf.mxu1 }
 0x13f   : > { %v1036_v18 = vpack.c.bf16 %v505_v13, %v503_v12  ;;  %v507_v23 = vadd.f32 %v506_v16, %v1516_v38  ;;  %833 = vst [vmem:[%s1523_s22 + $0x5c] sm:$0xf] %v1043_v30  ;;  %v1039_v36 = vpack.c.bf16 %v615_v31, %v615_v31  ;;  %v636_v37 = vadd.f32 %v1102_v33, %v1528_v50 }
 0x140   : > { %v508_v21 = vpop.f32.mrf.mxu0  ;;  %v627_v41 = vpop.f32.mrf.mxu1 }
 0x141   : > { %826 = vst [vmem:[%s1523_s22 + $0x30] sm:$0xff] %v1036_v18  ;;  %v509_v24 = vadd.f32 %v508_v21, %v1518_v39  ;;  %829 = vst [vmem:[%s1523_s22 + $0x44] sm:$0xf] %v1039_v36  ;;  %v1049_v43 = vpack.c.bf16 %v636_v37, %v636_v37  ;;  %v628_v44 = vadd.f32 %v627_v41, %v1528_v50 }
 0x142   : > { %v512_v27 = vpop.f32.mrf.mxu0  ;;  %v1103_v46 = vpop.f32.mrf.mxu1 }
 0x143   : > { %v1038_v29 = vpack.c.bf16 %v509_v24, %v507_v23  ;;  %v513_v34 = vadd.f32 %v512_v27, %v1516_v38  ;;  %839 = vst [vmem:[%s1523_s22 + $0x80] sm:$0xf] %v1049_v43  ;;  %v1045_v49 = vpack.c.bf16 %v628_v44, %v628_v44  ;;  %v639_v51 = vadd.f32 %v1103_v46, %v1528_v50 }
 0x144   : > { %v514_v32 = vpop.f32.mrf.mxu0  ;;  %v630_v53 = vpop.f32.mrf.mxu1 }
 0x145   : > { %828 = vst [vmem:[%s1523_s22 + $0x3c] sm:$0xff] %v1038_v29  ;;  %v515_v35 = vadd.f32 %v514_v32, %v1518_v39  ;;  %835 = vst [vmem:[%s1523_s22 + $0x68] sm:$0xf] %v1045_v49  ;;  %v1051_v55 = vpack.c.bf16 %v639_v51, %v639_v51  ;;  %v631_v56 = vadd.f32 %v630_v53, %v1528_v50 }
 0x146   : > { %v516_v40 = vpop.f32.mrf.mxu0  ;;  %v1106_v58 = vpop.f32.mrf.mxu1 }
 0x147   : > { %v1040_v42 = vpack.c.bf16 %v515_v35, %v513_v34  ;;  %v517_v47 = vadd.f32 %v516_v40, %v1516_v38  ;;  %841 = vst [vmem:[%s1523_s22 + $0x8c] sm:$0xf] %v1051_v55  ;;  %v1047_v61 = vpack.c.bf16 %v631_v56, %v631_v56  ;;  %v652_v62 = vadd.f32 %v1106_v58, %v1528_v50 }
 0x148   : > { %v518_v45 = vpop.f32.mrf.mxu0  ;;  %v643_v0 = vpop.f32.mrf.mxu1 }
 0x149   : > { %830 = vst [vmem:[%s1523_s22 + $0x48] sm:$0xff] %v1040_v42  ;;  %v519_v48 = vadd.f32 %v518_v45, %v1518_v39  ;;  %837 = vst [vmem:[%s1523_s22 + $0x74] sm:$0xf] %v1047_v61  ;;  %v1057_v2 = vpack.c.bf16 %v652_v62, %v652_v62  ;;  %v644_v3 = vadd.f32 %v643_v0, %v1528_v50 }
 0x14a   : > { %v522_v52 = vpop.f32.mrf.mxu0  ;;  %v1107_v5 = vpop.f32.mrf.mxu1 }
 0x14b   : > { %v1042_v54 = vpack.c.bf16 %v519_v48, %v517_v47  ;;  %v523_v59 = vadd.f32 %v522_v52, %v1516_v38  ;;  %847 = vst [vmem:[%s1523_s22 + $0xb0] sm:$0xf] %v1057_v2  ;;  %v1053_v8 = vpack.c.bf16 %v644_v3, %v644_v3  ;;  %v655_v9 = vadd.f32 %v1107_v5, %v1528_v50 }
 0x14c   : > { %v524_v57 = vpop.f32.mrf.mxu0  ;;  %v646_v11 = vpop.f32.mrf.mxu1 }
 0x14d   : > { %832 = vst [vmem:[%s1523_s22 + $0x54] sm:$0xff] %v1042_v54  ;;  %v525_v60 = vadd.f32 %v524_v57, %v1518_v39  ;;  %843 = vst [vmem:[%s1523_s22 + $0x98] sm:$0xf] %v1053_v8  ;;  %v1059_v13 = vpack.c.bf16 %v655_v9, %v655_v9  ;;  %v647_v14 = vadd.f32 %v646_v11, %v1528_v50 }
 0x14e   : > { %v526_v63 = vpop.f32.mrf.mxu0 }
 0x14f   : > { %v1044_v1 = vpack.c.bf16 %v525_v60, %v523_v59  ;;  %v527_v6 = vadd.f32 %v526_v63, %v1516_v38  ;;  %849 = vst [vmem:[%s1523_s22 + $0xbc] sm:$0xf] %v1059_v13  ;;  %v1055_v18 = vpack.c.bf16 %v647_v14, %v647_v14 }
 0x150   : > { %v528_v4 = vpop.f32.mrf.mxu0 }
 0x151   : > { %834 = vst [vmem:[%s1523_s22 + $0x60] sm:$0xff] %v1044_v1  ;;  %v529_v7 = vadd.f32 %v528_v4, %v1518_v39  ;;  %845 = vst [vmem:[%s1523_s22 + $0xa4] sm:$0xf] %v1055_v18 }
 0x152   : > { %v532_v10 = vpop.f32.mrf.mxu0 }
 0x153   : > { %v1046_v12 = vpack.c.bf16 %v529_v7, %v527_v6  ;;  %v533_v16 = vadd.f32 %v532_v10, %v1516_v38 }
 0x154   : > { %v534_v15 = vpop.f32.mrf.mxu0 }
 0x155   : > { %836 = vst [vmem:[%s1523_s22 + $0x6c] sm:$0xff] %v1046_v12  ;;  %v535_v17 = vadd.f32 %v534_v15, %v1518_v39 }
 0x156   : > { %v536_v19 = vpop.f32.mrf.mxu0 }
 0x157   : > { %v1048_v20 = vpack.c.bf16 %v535_v17, %v533_v16  ;;  %v537_v22 = vadd.f32 %v536_v19, %v1516_v38 }
 0x158   : > { %v538_v21 = vpop.f32.mrf.mxu0 }
 0x159   : > { %838 = vst [vmem:[%s1523_s22 + $0x78] sm:$0xff] %v1048_v20  ;;  %v539_v23 = vadd.f32 %v538_v21, %v1518_v39 }
 0x15a   : > { %v542_v50 = vpop.f32.mrf.mxu0 }
 0x15b   : > { %v1050_v24 = vpack.c.bf16 %v539_v23, %v537_v22  ;;  %v543_v26 = vadd.f32 %v542_v50, %v1516_v38 }
 0x15c   : > { %v544_v25 = vpop.f32.mrf.mxu0 }
 0x15d   : > { %840 = vst [vmem:[%s1523_s22 + $0x84] sm:$0xff] %v1050_v24  ;;  %v545_v27 = vadd.f32 %v544_v25, %v1518_v39 }
 0x15e   : > { %v546_v28 = vpop.f32.mrf.mxu0 }
 0x15f   : > { %v1052_v29 = vpack.c.bf16 %v545_v27, %v543_v26  ;;  %v547_v31 = vadd.f32 %v546_v28, %v1516_v38 }
 0x160   : > { %v548_v30 = vpop.f32.mrf.mxu0 }
 0x161   : > { %842 = vst [vmem:[%s1523_s22 + $0x90] sm:$0xff] %v1052_v29  ;;  %v549_v32 = vadd.f32 %v548_v30, %v1518_v39 }
 0x162   : > { %v552_v33 = vpop.f32.mrf.mxu0 }
 0x163   : > { %v1054_v34 = vpack.c.bf16 %v549_v32, %v547_v31  ;;  %v553_v36 = vadd.f32 %v552_v33, %v1516_v38 }
 0x164   : > { %v554_v35 = vpop.f32.mrf.mxu0 }
 0x165   : > { %844 = vst [vmem:[%s1523_s22 + $0x9c] sm:$0xff] %v1054_v34  ;;  %v555_v37 = vadd.f32 %v554_v35, %v1518_v39 }
 0x166   : > { %v556_v40 = vpop.f32.mrf.mxu0 }
 0x167   : > { %v1056_v41 = vpack.c.bf16 %v555_v37, %v553_v36  ;;  %v557_v43 = vadd.f32 %v556_v40, %v1516_v38 }
 0x168   : > { %v558_v42 = vpop.f32.mrf.mxu0 }
 0x169   : > { %846 = vst [vmem:[%s1523_s22 + $0xa8] sm:$0xff] %v1056_v41  ;;  %v559_v44 = vadd.f32 %v558_v42, %v1518_v39 }
 0x16b   : > { %v1058_v45 = vpack.c.bf16 %v559_v44, %v557_v43 }
 0x16d   : > { %848 = vst [vmem:[%s1523_s22 + $0xb4] sm:$0xff] %v1058_v45 }
 0x16e   : > { %1281 = shalt.err (!%p1278_p0)
}
 0x16f   : > { %s1282_s21 = scalar_lea.hbm %s1609_s7, 3072  ;;  %s1286_s29 = scalar_lea.hbm %s1657_s3, 12288 }
 0x170   : > { %p1283_p5 = scmp.ne.s32.totalorder %s1609_s7, %s1282_s21  ;;  %p1287_p4 = scmp.lt.s32.totalorder %s1609_s7, %s1657_s3 }
 0x171   : > { %p1288_p6 = scmp.lt.s32.totalorder %s1286_s29, %s1282_s21 }
 0x172   : > { %p1284_p9 = pnand %p1283_p5, %p1673_p10 }
 0x173   : > { %p1289_p8 = por %p1288_p6, %p1287_p4 }
 0x174   : > { %p1285_p1 = pneg %p1284_p9 }
 0x176   : > { %p1290_p3 = pnand %p1289_p8, %p1285_p1 }
 0x178   : > { %1293 = shalt.err (!%p1290_p3)
}
 0x179   : > { %s1346_s17 = smov 192   ;;  %s1347_s22 = smov 12  }
 0x17a   : > { %1116 = dma.vmem_to_hbm [thread:$0]  (%p1673_p10), %s1611_s25, 3072, %s1609_s7, %s851_s16, %s1346_s17, %s1346_s17, %s1347_s22  }
 0x17b PF: > { %p1133_p7 = scmp.ge.s32.totalorder %s1336_s15, 2  ;;  %s880_s23 = sand.u32 1, %s1324_s12  }
 0x17c   : > { %p1674_p11 = scmp.ne.s32.totalorder %s1663_s19, 0  ;;  %s881_s30 = scalar_lea.sflag [#allocation4], %s880_s23 }
 0x17e   : > { %p1127_p12 = pnand %p1133_p7, %p1674_p11 }
 0x180   : > { %p1128_p2 = pneg %p1127_p12 }
 0x182   : > { %1319 = dma.done.wait (%p1128_p2), %s881_s30, 3072  }
 0x183   : > { %1321 = vsyncadd (%p1128_p2), %s881_s30, 4294964224  ;;  %p17_p13 = scmp.ge.s32.totalorder %s1421_s24, 6   ;;  %s1675_s12 = smov %s1328_s13 }
 0x184   : > { %s1676_s13 = smov %s1332_s14  ;;  %s1677_s14 = smov %s1438_s5 }
 0x185   : > { %s1678_s15 = smov %s1421_s24  ;;  %19 = sbr.rel (!%p17_p13) target bundleno = 6 (0x6), region = 81 }
 0x18a   :  { %886 = vsyncpa [#allocation3], 1 }
 0x18b   :  { %888 = vsyncpa [#allocation3 + $0x1], 1 }
 0x18c   :  { %889 = vsyncpa [#allocation6], 1 }
 0x18d   :  { %890 = vsyncpa [#allocation4], 1 }
 0x18e   :  { %892 = vsyncpa [#allocation4 + $0x1], 1 }

</bundles_post_ra>
